<compile_context>
chip_gen: v6e
topology: v6e:2x2x1
jax: 0.10.0
libtpu: 0.0.40
codegen_flags: <defaults>
</compile_context>

<pallas_src>
import jax
import jax.numpy as jnp
from jax.experimental import pallas as pl
from jax.experimental.pallas import tpu as pltpu


def _rdb_conv_kernel(p_ref, w_ref, b_ref, o_ref):
    # p_ref: (1, Krp, Mp)  im2col patches for one image (reduction dim, spatial)
    # w_ref: (G, Krp)      conv weights with branch scale pre-folded
    # b_ref: (G, 1)        conv bias
    # o_ref: (1, G, Mp)    output, channels-major, lane-dense spatial last dim
    acc = jnp.dot(w_ref[...], p_ref[0],
                  preferred_element_type=jnp.float32)      # (G, Mp) single MXU matmul
    acc = acc + b_ref[...]                                  # (G, 1) broadcast bias
    o_ref[0] = jnp.maximum(acc, 0.0).astype(o_ref.dtype)    # ReLU epilogue


def rdb_conv_pallas(x_nchw, chan_scale, conv_w_oihw, conv_b, ksize=3):
    """ReLU(Conv2d(Cin->G, ksize, pad=(ksize-1)//2, stride=1)(x * scale_per_channel))."""
    N, Cin, H, W = x_nchw.shape
    G = conv_w_oihw.shape[0]
    K = ksize
    pad = (K - 1) // 2

    # Fold the per-channel branch scale into the conv weights (conv is linear in x).
    w_scaled = conv_w_oihw.astype(jnp.float32) * \
        chan_scale.astype(jnp.float32)[None, :, None, None]          # (G, Cin, K, K)
    # Reduction-dim ordering (kh, kw, c):  (G, Cin, K, K) -> (G, K, K, Cin) -> (G, K*K*Cin)
    w2 = jnp.transpose(w_scaled, (0, 2, 3, 1)).reshape(G, K * K * Cin)

    # im2col in the wrapper:
    #   patches[n, (kh*K + kw)*Cin + c, h*W + w] = x_padded[n, c, h + kh, w + kw]
    # so the reduction dim sits second-to-last and the spatial dim is last (lane-dense).
    x_pad = jnp.pad(x_nchw.astype(jnp.float32),
                    ((0, 0), (0, 0), (pad, pad), (pad, pad)))
    taps = [x_pad[:, :, kh:kh + H, kw:kw + W].reshape(N, Cin, H * W)
            for kh in range(K) for kw in range(K)]
    patches = jnp.concatenate(taps, axis=1)                          # (N, K*K*Cin, H*W)

    # Pad reduction dim to a multiple of 8 (sublanes) and spatial dim to a
    # multiple of 128 (lanes) so all loads/stores are dense and unmasked.
    Kr = K * K * Cin
    Krp = ((Kr + 7) // 8) * 8
    M = H * W
    Mp = ((M + 127) // 128) * 128
    patches = jnp.pad(patches, ((0, 0), (0, Krp - Kr), (0, Mp - M)))
    w2 = jnp.pad(w2, ((0, 0), (0, Krp - Kr)))
    b2 = conv_b.astype(jnp.float32).reshape(G, 1)

    out = pl.pallas_call(
        _rdb_conv_kernel,
        out_shape=jax.ShapeDtypeStruct((N, G, Mp), jnp.float32),
        grid=(N,),
        in_specs=[
            pl.BlockSpec((1, Krp, Mp), lambda n: (n, 0, 0)),   # per-image patches
            pl.BlockSpec((G, Krp), lambda n: (0, 0)),          # resident weights
            pl.BlockSpec((G, 1), lambda n: (0, 0)),            # resident bias
        ],
        out_specs=pl.BlockSpec((1, G, Mp), lambda n: (n, 0, 0)),
        compiler_params=pltpu.CompilerParams(
            dimension_semantics=("parallel",)),
    )(patches, w2, b2)

    # (N, G, H*W) -> (N, G, H, W) is a free reshape (already NCHW-ordered).
    return out[:, :, :M].reshape(N, G, H, W)


def rdb_conv_forward(temp, weight, conv_w, conv_b, ksize=3):
    """JAX equivalent of RDB_Conv.forward(temp, weight) -> (out, params)."""
    # TODO(synk): the PyTorch original mutates temp[i] in place (temp[i] *= weight[i]);
    # that side effect on the caller's list is not reproduced here.
    n_branches = len(temp)
    chans = [int(t.shape[1]) for t in temp]
    length = jnp.sum((weight >= 0.1).astype(jnp.float32))

    if n_branches > 1:
        # per-channel scale replicating temp[i] *= weight[i] followed by cat(dim=1)
        scale = jnp.concatenate(
            [weight[i] * jnp.ones((c,), jnp.float32) for i, c in enumerate(chans)])
        x = jnp.concatenate(temp, axis=1)
        params = (jnp.sum(jnp.where(weight > 0.1, weight, 0.0)) * length).reshape(1)
    else:
        scale = jnp.ones((chans[0],), jnp.float32)
        x = temp[0]
        params = jnp.zeros((1,), jnp.float32)

    out = rdb_conv_pallas(x, scale, conv_w, conv_b, ksize)
    return out, params


if __name__ == "__main__":
    key = jax.random.PRNGKey(0)
    k_temp, k_w, k_b = jax.random.split(key, 3)

    # RDB_Conv(inChannels=12, growRate=8, kSize=3); temp = 3 branches of 4 channels
    n_branches, c_per, N, H, W = 3, 4, 2, 16, 16
    Cin = n_branches * c_per
    G = 8
    ksize = 3

    temp = [0.1 * jax.random.normal(k, (N, c_per, H, W), jnp.float32)
            for k in jax.random.split(k_temp, n_branches)]
    weight = jnp.array([0.5, 0.05, 0.3], dtype=jnp.float32)

    conv_w = 0.1 * jax.random.normal(k_w, (G, Cin, ksize, ksize), jnp.float32)  # OIHW
    conv_b = 0.01 * jax.random.normal(k_b, (G,), jnp.float32)

    out, params = rdb_conv_forward(temp, weight, conv_w, conv_b, ksize)
    out = jax.block_until_ready(out)
    params = jax.block_until_ready(params)

    # Plain-JAX reference check (scale, concat, conv2d pad=1, bias, ReLU)
    chan_scale = jnp.concatenate(
        [weight[i] * jnp.ones((c_per,), jnp.float32) for i in range(n_branches)])
    x_ref = jnp.concatenate(temp, axis=1) * chan_scale[None, :, None, None]
    ref = jax.lax.conv_general_dilated(
        x_ref, conv_w, window_strides=(1, 1), padding=((1, 1), (1, 1)),
        dimension_numbers=("NCHW", "OIHW", "NCHW"),
        precision=jax.lax.Precision.HIGHEST)
    ref = jnp.maximum(ref + conv_b[None, :, None, None], 0.0)

    assert out.shape == (N, G, H, W), out.shape
    assert params.shape == (1,), params.shape
    assert jnp.allclose(out, ref, atol=1e-4, rtol=1e-4), \
        float(jnp.max(jnp.abs(out - ref)))
    print("KERNEL_OK")
</pallas_src>

<mosaic_0001>
module attributes {stable_mosaic.version = 11 : i64} {
  func.func @_rdb_conv_kernel(%arg0: i32, %arg1: memref<1x112x256xf32, #tpu.memory_space<vmem>>, %arg2: memref<8x112xf32, #tpu.memory_space<vmem>>, %arg3: memref<8x1xf32, #tpu.memory_space<vmem>>, %arg4: memref<1x8x256xf32, #tpu.memory_space<vmem>>) attributes {dimension_semantics = [#tpu.dimension_semantics<parallel>], iteration_bounds = array<i64: 2>, scalar_prefetch = 0 : i64, scratch_operands = 0 : i64, tpu.core_type = #tpu.core_type<tc>, window_params = [{transform_indices = @transform_0, window_bounds = array<i64: 1, 112, 256>}, {pipeline_mode = #tpu.pipeline_mode<synchronous>, transform_indices = @transform_1, window_bounds = array<i64: 8, 112>}, {pipeline_mode = #tpu.pipeline_mode<synchronous>, transform_indices = @transform_2, window_bounds = array<i64: 8, 1>}, {transform_indices = @transform_3, window_bounds = array<i64: 1, 8, 256>}]} {
    %c0 = arith.constant 0 : index
    %c0_0 = arith.constant 0 : index
    %0 = vector.load %arg2[%c0, %c0_0] : memref<8x112xf32, #tpu.memory_space<vmem>>, vector<8x112xf32>
    %c0_1 = arith.constant 0 : index
    %c0_2 = arith.constant 0 : index
    %c0_3 = arith.constant 0 : index
    %1 = vector.load %arg1[%c0_1, %c0_2, %c0_3] : memref<1x112x256xf32, #tpu.memory_space<vmem>>, vector<1x112x256xf32>
    %2 = vector.shape_cast %1 : vector<1x112x256xf32> to vector<112x256xf32>
    %cst = arith.constant dense<0.000000e+00> : vector<8x256xf32>
    %3 = tpu.matmul %0, %2, %cst {dimension_numbers = #tpu.dot_dimension_numbers<[1], [0], [0], [1], [0, 0, 1, 1], [], []>} : vector<8x112xf32>, vector<112x256xf32>, vector<8x256xf32> -> vector<8x256xf32>
    %c0_4 = arith.constant 0 : index
    %c0_5 = arith.constant 0 : index
    %4 = vector.load %arg3[%c0_4, %c0_5] : memref<8x1xf32, #tpu.memory_space<vmem>>, vector<8x1xf32>
    %5 = vector.broadcast %4 : vector<8x1xf32> to vector<8x256xf32>
    %6 = arith.addf %3, %5 : vector<8x256xf32>
    %cst_6 = arith.constant 0.000000e+00 : f32
    %7 = vector.broadcast %cst_6 : f32 to vector<8x256xf32>
    %8 = arith.maximumf %6, %7 : vector<8x256xf32>
    %c0_7 = arith.constant 0 : index
    %c0_8 = arith.constant 0 : index
    %c0_9 = arith.constant 0 : index
    %9 = vector.load %arg4[%c0_7, %c0_8, %c0_9] : memref<1x8x256xf32, #tpu.memory_space<vmem>>, vector<1x8x256xf32>
    %10 = vector.shape_cast %9 : vector<1x8x256xf32> to vector<8x256xf32>
    %11 = vector.shape_cast %8 : vector<8x256xf32> to vector<1x8x256xf32>
    tpu.vector_store %arg4[%c0_7, %c0_8, %c0_9], %11 {strides = array<i32>} : memref<1x8x256xf32, #tpu.memory_space<vmem>>, vector<1x8x256xf32>,
    return
  }
  func.func @transform_0(%arg0: i32) -> (i32, i32, i32) {
    %c0_i32 = arith.constant 0 : i32
    %c0_i32_0 = arith.constant 0 : i32
    %c0_i32_1 = arith.constant 0 : i32
    return %arg0, %c0_i32, %c0_i32_0 : i32, i32, i32
  }
  func.func @transform_1(%arg0: i32) -> (i32, i32) {
    %c0_i32 = arith.constant 0 : i32
    %c0_i32_0 = arith.constant 0 : i32
    %c0_i32_1 = arith.constant 0 : i32
    return %c0_i32, %c0_i32_0 : i32, i32
  }
  func.func @transform_2(%arg0: i32) -> (i32, i32) {
    %c0_i32 = arith.constant 0 : i32
    %c0_i32_0 = arith.constant 0 : i32
    %c0_i32_1 = arith.constant 0 : i32
    return %c0_i32, %c0_i32_0 : i32, i32
  }
  func.func @transform_3(%arg0: i32) -> (i32, i32, i32) {
    %c0_i32 = arith.constant 0 : i32
    %c0_i32_0 = arith.constant 0 : i32
    %c0_i32_1 = arith.constant 0 : i32
    return %arg0, %c0_i32, %c0_i32_0 : i32, i32, i32
  }
}

</mosaic_0001>

<bundles_post_ra>
// kernel: tpu_custom_call.1
= control target key start
LH: loop header
LB: loop body
LE: loop exit
PB: predicated region body
PF: predicated region fallthrough
CT: control target
= control target key end

     0   :  { %8 = vsyncpa [#allocation3], 0  ;;  %s746_s0 = inlined_call_operand.hbm [shape: f32[2,112,256], index: 0, kind: input, shape index: {}]   ;;  %s747_s1 = inlined_call_operand.vmem [shape: f32[8,112], index: 1, kind: input, shape index: {}]   ;;  %s748_s2 = inlined_call_operand.vmem [shape: f32[8,1], index: 2, kind: input, shape index: {}]   ;;  %s749_s3 = inlined_call_operand.hbm [shape: f32[2,8,256], index: 3, kind: output, shape index: {}]  }
   0x1   :  { %10 = vsyncpa [#allocation3 + $0x1], 0 }
   0x2   :  { %11 = vsyncpa [#allocation4], 0 }
   0x3   :  { %13 = vsyncpa [#allocation4 + $0x1], 0  ;;  %s575_s12 = smov 0   ;;  %s577_s13 = smov 0  }
   0x4   :  { %s579_s14 = smov 0   ;;  %s581_s15 = smov 0  }
   0x5 LB: > { %s596_s16 = sadd.s32 4294967295, %s547_s15   ;;  %s388_s17 = sadd.s32 4294967294, %s547_s15   ;;  %s547_s15 = sphi %s581_s15, %s763_s15   ;;  %s543_s14 = sphi %s579_s14, %s762_s14   ;;  %s539_s13 = sphi %s577_s13, %s761_s13   ;;  %s535_s12 = sphi %s575_s12, %s760_s12  }
   0x6   : > { %s600_s18 = sadd.s32 1, %s547_s15   ;;  %s26_s19 = sadd.s32 1, %s543_s14 }
   0x7   : > { %s23_s20 = ssub.s32 %s547_s15, %s600_s18  ;;  %p33_p0 = scmp.ne.s32.totalorder %s543_s14, %s539_s13 }
   0x8   : > { %p24_p1 = scmp.eq.s32.totalorder %s23_s20, 0  ;;  %p34_p2 = scmp.eq.s32.totalorder %s547_s15, 0 }
   0x9   : > { %p39_p3 = scmp.ne.s32.totalorder %s539_s13, %s535_s12  ;;  %p40_p4 = scmp.eq.s32.totalorder %s596_s16, 0 }
   0xa   : > { %s612_s21 = scalar_select %p24_p1, %s543_s14, %s26_s19  }
   0xb   : > { %p35_p5 = por %p34_p2, %p33_p0  ;;  %p614_p6 = por %p40_p4, %p39_p3 }
   0xc   : > { %p105_p7 = scmp.eq.s32.totalorder %s596_s16, 1  ;;  %p111_p8 = scmp.eq.s32.totalorder %s388_s17, 1 }
   0xd   : > { %s752_s22 = scalar_select %p614_p6, 1, 0 }
   0xe   : > { %p416_p10 = scmp.lt.s32.totalorder %s547_s15, 2  ;;  %p621_p11 = por %p105_p7, %p33_p0 }
   0xf   : > { %p625_p12 = por %p111_p8, %p39_p3  ;;  %s137_s25 = sand.u32 1, %s543_s14  }
  0x10   : > { %s753_s23 = scalar_select %p621_p11, 1, 0 }
  0x11   : > { %s754_s24 = scalar_select %p625_p12, 1, 0 }
  0x12   : > { %s402_s26 = smul.u32 3584, %s547_s15  ;;  %p636_p13 = pnand %p416_p10, %p35_p5 }
  0x13   : > { %s401_s27 = smul.u32 224, %s137_s25  ;;  %s642_s7 = scalar_lea.sflag [#allocation3], %s137_s25 }
  0x14   : > { %s634_s30 = scalar_lea.hbm %s746_s0, %s402_s26  ;;  %p457_p1 = pneg %p636_p13 }
  0x15   : > { %s141_s5 = scalar_lea.vmem [#allocation2], %s401_s27  ;;  %s455_s8 = scalar_lea.hbm %s634_s30, 3584 }
  0x16   : > { %s148_s6 = sshll.u32 %s141_s5, 4  ;;  %p456_p0 = scmp.ne.s32.totalorder %s634_s30, %s455_s8  ;;  %s640_s6 = int_to_ptr.vmem [resolvable:$true] %s148_s6 }
  0x17   : > { %s460_s11 = scalar_lea.hbm %s746_s0, 7168  ;;  %p461_p4 = scmp.lt.s32.totalorder %s634_s30, %s746_s0 }
  0x18   : > { %p458_p2 = pnand %p457_p1, %p456_p0  ;;  %p462_p5 = scmp.lt.s32.totalorder %s460_s11, %s455_s8 }
  0x1a   : > { %p459_p3 = pneg %p458_p2  ;;  %p463_p7 = por %p462_p5, %p461_p4 }
  0x1c   : > { %p464_p8 = pnand %p463_p7, %p459_p3 }
  0x1e   : > { %467 = shalt.err (!%p464_p8)
}
  0x1f   : > { %s468_s20 = scalar_lea.vmem %s640_s6, 3584  ;;  %s549_s25 = smov [#allocation2]  }
  0x20   : > { %p469_p10 = scmp.ne.s32.totalorder %s640_s6, %s468_s20  ;;  %s473_s26 = sshll.u32 %s549_s25, 4  ;;  %s474_s26 = int_to_ptr.vmem [resolvable:$false] %s473_s26 }
  0x21   : > { %s475_s27 = scalar_lea.vmem %s474_s26, 7168  ;;  %p476_p2 = scmp.lt.s32.totalorder %s640_s6, %s474_s26 }
  0x22   : > { %p471_p9 = pnand %p469_p10, %p457_p1  ;;  %p477_p12 = scmp.lt.s32.totalorder %s475_s27, %s468_s20 }
  0x24   : > { %p472_p0 = pneg %p471_p9  ;;  %p478_p11 = por %p477_p12, %p476_p2 }
  0x26   : > { %p479_p6 = pnand %p478_p11, %p472_p0 }
  0x28   : > { %482 = shalt.err (!%p479_p6)
}
  0x29   : > { %s550_s28 = smov 256   ;;  %s551_s29 = smov 16  }
  0x2a   : > { %411 = dma.hbm_to_vmem [thread:$0]  (!%p636_p13), %s634_s30, 3584, %s640_s6, %s642_s7, %s550_s28, %s550_s28, %s551_s29  }
  0x2b   : > { %p392_p9 = scmp.ge.s32.totalorder %s547_s15, 1  ;;  %p156_p1 = scmp.lt.s32.totalorder %s547_s15, 3 }
  0x2d   : > { %p157_p3 = pnand %p392_p9, %p156_p1 }
  0x2e   : > { %s666_s5 = sand.u32 (!%p157_p3), 1, %s539_s13   ;;  %p756_p6 = scmp.ne.s32.totalorder (!%p157_p3), %s752_s22, 0 }
  0x2f   : > { %160 = sbr.rel (%p157_p3) target bundleno = 295 (0x127), region = 32  ;;  %s163_s9 = scalar_lea.sflag (!%p157_p3), [#allocation3], %s666_s5 }
  0x30   : > { %s403_s8 = smul.u32 (!%p157_p3), 224, %s666_s5 }
  0x32   : > { %s670_s10 = scalar_lea.vmem (!%p157_p3), [#allocation2], %s403_s8 }
  0x34   : > { %526 = dma.done.wait (%p756_p6), %s163_s9, 3584  }
  0x35   : > { %528 = vsyncadd (%p756_p6), %s163_s9, 4294963712  ;;  %v552_v0 = vmov 0.0   ;;  %v553_v1 = vmov 0   ;;  %v217_v2 = vld [vmem:[%s670_s10 + $0xd8] sm:$0xff]  ;;  %v216_v3 = vld [vmem:[%s670_s10 + $0xd0] sm:$0xff]  ;;  %vm224_vm0 = vcmask 916480  }
  0x36   : > { %292 = vmatprep.mubr.f32.mxu0 %v552_v0  ;;  %454 = vset.pattern.permute.xlu0 %v553_v1  ;;  %v215_v4 = vld [vmem:[%s670_s10 + $0xc8] sm:$0xff]  ;;  %v214_v5 = vld [vmem:[%s670_s10 + $0xc0] sm:$0xff]  ;;  %v213_v6 = vld [vmem:[%s670_s10 + $0xb8] sm:$0xff]  ;;  %s393_s7 = sshll.u32 %s666_s5, 4  ;;  %s400_s11 = sshll.u32 %s596_s16, 8 }
  0x37   : > { %232 = vmatprep.subr.mxu0 %v217_v2  ;;  %v212_v7 = vld [vmem:[%s670_s10 + $0xb0] sm:$0xff]  ;;  %v211_v8 = vld [vmem:[%s670_s10 + $0xa8] sm:$0xff]  ;;  %v210_v9 = vld [vmem:[%s670_s10 + $0xa0] sm:$0xff]  ;;  %s188_s17 = scalar_lea.vmem [#allocation5], %s393_s7  ;;  %s316_s26 = scalar_lea.hbm %s749_s3, %s400_s11 }
  0x38   : > { %233 = vmatpush1.msra.mxu0 %v216_v3  ;;  %v209_v10 = vld [vmem:[%s670_s10 + $0x98] sm:$0xff]  ;;  %v208_v11 = vld [vmem:[%s670_s10 + $0x90] sm:$0xff]  ;;  %v207_v12 = vld [vmem:[%s670_s10 + $0x88] sm:$0xff]  ;;  %s318_s19 = sshll.u32 %s188_s17, 4  ;;  %s304_s27 = scalar_lea.sflag [#allocation4], %s666_s5  ;;  %s319_s19 = int_to_ptr.vmem [resolvable:$true] %s318_s19 }
  0x39   : > { %234 = vmatprep.subr.mxu0 %v215_v4  ;;  %v206_v13 = vld [vmem:[%s670_s10 + $0x80] sm:$0xff]  ;;  %v205_v15 = vld [vmem:[%s670_s10 + $0x78] sm:$0xff]  ;;  %v204_v16 = vld [vmem:[%s670_s10 + $0x70] sm:$0xff]  ;;  %s483_s28 = scalar_lea.vmem %s319_s19, 256  ;;  %p757_p12 = scmp.ne.s32.totalorder %s753_s23, 0 }
  0x3a   : > { %235 = vmatpush1.msra.mxu0 %v214_v5  ;;  %v218_v14 = vld [vmem:[%s748_s2] sm:$0xff]  ;;  %v203_v17 = vld [vmem:[%s670_s10 + $0x68] sm:$0xff]  ;;  %v201_v19 = vld [vmem:[%s670_s10 + $0x58] sm:$0xff]  ;;  %p484_p11 = scmp.ne.s32.totalorder %s319_s19, %s483_s28  ;;  %s554_s29 = smov [#allocation5]  }
  0x3b   : > { %236 = vmatprep.subr.mxu0 %v213_v6  ;;  %221 = vperm.xlu0 %454, %v218_v14   ;;  %v202_v18 = vld [vmem:[%s670_s10 + $0x60] sm:$0xff]  ;;  %v200_v20 = vld [vmem:[%s670_s10 + $0x50] sm:$0xff]  ;;  %v199_v21 = vld [vmem:[%s670_s10 + $0x48] sm:$0xff]  ;;  %s487_s16 = sshll.u32 %s554_s29, 4  ;;  %s488_s16 = int_to_ptr.vmem [resolvable:$false] %s487_s16 }
  0x3c   : > { %237 = vmatpush1.msra.mxu0 %v212_v7  ;;  %v198_v22 = vld [vmem:[%s670_s10 + $0x40] sm:$0xff]  ;;  %v197_v23 = vld [vmem:[%s670_s10 + $0x38] sm:$0xff]  ;;  %v196_v24 = vld [vmem:[%s670_s10 + $0x30] sm:$0xff]  ;;  %p485_p13 = pnand %p484_p11, %p757_p12  ;;  %s489_s8 = scalar_lea.vmem %s488_s16, 512 }
  0x3d   : > { %238 = vmatprep.subr.mxu0 %v211_v8  ;;  %v195_v25 = vld [vmem:[%s670_s10 + $0x28] sm:$0xff]  ;;  %v194_v26 = vld [vmem:[%s670_s10 + $0x20] sm:$0xff]  ;;  %v193_v27 = vld [vmem:[%s670_s10 + $0x18] sm:$0xff]  ;;  %p490_p5 = scmp.lt.s32.totalorder %s319_s19, %s488_s16  ;;  %p491_p7 = scmp.lt.s32.totalorder %s489_s8, %s483_s28 }
  0x3e   : > { %239 = vmatpush1.msra.mxu0 %v210_v9  ;;  %v192_v28 = vld [vmem:[%s670_s10 + $0x10] sm:$0xff]  ;;  %v191_v29 = vld [vmem:[%s670_s10 + $0x8] sm:$0xff]  ;;  %v190_v30 = vld [vmem:[%s670_s10] sm:$0xff]  ;;  %p486_p4 = pneg %p485_p13 }
  0x3f   : > { %240 = vmatprep.subr.mxu0 %v209_v10  ;;  %v189_v31 = vld [vmem:[%s747_s1] sm:$0xff]  ;;  %p492_p8 = por %p491_p7, %p490_p5 }
  0x40   : > { %241 = vmatpush1.msra.mxu0 %v208_v11 }
  0x41   : > { %242 = vmatprep.subr.mxu0 %v207_v12  ;;  %p493_p10 = pnand %p492_p8, %p486_p4 }
  0x42   : > { %243 = vmatpush1.msra.mxu0 %v206_v13 }
  0x43   : > { %244 = vmatprep.subr.mxu0 %v205_v15 }
  0x44   : > { %245 = vmatpush1.msra.mxu0 %v204_v16 }
  0x45   : > { %246 = vmatprep.subr.mxu0 %v203_v17 }
  0x46   : > { %247 = vmatpush1.msra.mxu0 %v202_v18 }
  0x47   : > { %248 = vmatprep.subr.mxu0 %v201_v19 }
  0x48   : > { %249 = vmatpush1.msra.mxu0 %v200_v20 }
  0x49   : > { %250 = vmatprep.subr.mxu0 %v199_v21 }
  0x4a   : > { %251 = vmatpush1.msra.mxu0 %v198_v22 }
  0x4b   : > { %252 = vmatprep.subr.mxu0 %v197_v23 }
  0x4c   : > { %253 = vmatpush1.msra.mxu0 %v196_v24 }
  0x4d   : > { %254 = vmatprep.subr.mxu0 %v195_v25 }
  0x4e   : > { %255 = vmatpush1.msra.mxu0 %v194_v26 }
  0x4f   : > { %256 = vmatprep.subr.mxu0 %v193_v27 }
  0x50   : > { %257 = vmatpush1.msra.mxu0 %v192_v28 }
  0x51   : > { %258 = vmatprep.subr.mxu0 %v191_v29 }
  0x52   : > { %259 = vmatpush1.msra.mxu0 %v190_v30 }
  0x53   : > { %394 = vmatmul.mubr.msk.f32.vlgmr.msra.gmra.mxu0 %vm224_vm0, %v189_v31 }
  0xb6   : > { %v222_v32 = vpop.permute.xlu0 %221 }
 0x113   : > { %v294_v33 = vpop.f32.mrf.mxu0 }
 0x114   : > { %v295_v34 = vadd.f32 %v294_v33, %v222_v32 }
 0x115   : > { %v296_v35 = vpop.f32.mrf.mxu0 }
 0x116   : > { %v299_v36 = vmax.f32 %v295_v34, 0.0  ;;  %v297_v37 = vadd.f32 %v296_v35, %v222_v32 }
 0x118   : > { %301 = vst [vmem:[%s188_s17] sm:$0xff] %v299_v36  ;;  %v300_v38 = vmax.f32 %v297_v37, 0.0 }
 0x11a   : > { %302 = vst [vmem:[%s188_s17 + $0x8] sm:$0xff] %v300_v38 }
 0x11b   : > { %496 = shalt.err (!%p493_p10)
}
 0x11c   : > { %s497_s9 = scalar_lea.hbm %s316_s26, 256  ;;  %s501_s22 = scalar_lea.hbm %s749_s3, 512 }
 0x11d   : > { %p498_p0 = scmp.ne.s32.totalorder %s316_s26, %s497_s9  ;;  %p502_p1 = scmp.lt.s32.totalorder %s316_s26, %s749_s3 }
 0x11e   : > { %p503_p3 = scmp.lt.s32.totalorder %s501_s22, %s497_s9 }
 0x11f   : > { %p499_p2 = pnand %p498_p0, %p757_p12 }
 0x120   : > { %p504_p6 = por %p503_p3, %p502_p1 }
 0x121   : > { %p500_p9 = pneg %p499_p2 }
 0x123   : > { %p505_p11 = pnand %p504_p6, %p500_p9 }
 0x125   : > { %508 = shalt.err (!%p505_p11)
}
 0x126   : > { %406 = dma.vmem_to_hbm [thread:$0]  (%p757_p12), %s319_s19, 256, %s316_s26, %s304_s27  }
 0x127 PF: > { %s330_s6 = sand.u32 1, %s535_s12   ;;  %p758_p13 = scmp.ne.s32.totalorder %s754_s24, 0 }
 0x128   : > { %p759_p4 = scmp.ge.s32.totalorder %s547_s15, 2  ;;  %s331_s7 = scalar_lea.sflag [#allocation4], %s330_s6 }
 0x12a   : > { %p413_p5 = pnand %p759_p4, %p758_p13 }
 0x12c   : > { %p414_p7 = pneg %p413_p5 }
 0x12e   : > { %530 = dma.done.wait (%p414_p7), %s331_s7, 256  }
 0x12f   : > { %532 = vsyncadd (%p414_p7), %s331_s7, 4294967040  ;;  %p16_p8 = scmp.ge.s32.totalorder %s600_s18, 4   ;;  %s760_s12 = smov %s539_s13 }
 0x130   : > { %s761_s13 = smov %s543_s14  ;;  %s762_s14 = smov %s612_s21 }
 0x131   : > { %s763_s15 = smov %s600_s18  ;;  %18 = sbr.rel (!%p16_p8) target bundleno = 5 (0x5), region = 77 }
 0x136   :  { %336 = vsyncpa [#allocation3], 1 }
 0x137   :  { %338 = vsyncpa [#allocation3 + $0x1], 1 }
 0x138   :  { %339 = vsyncpa [#allocation4], 1 }
 0x139   :  { %341 = vsyncpa [#allocation4 + $0x1], 1 }

</bundles_post_ra>
